<compile_context>
chip_gen: v7x
topology: tpu7x:2x2x1
jax: 0.10.0
libtpu: 0.0.40
codegen_flags: <defaults>
</compile_context>

<pallas_src>
import functools

import jax
import jax.numpy as jnp
from jax.experimental import pallas as pl
from jax.experimental.pallas import tpu as pltpu


# ----------------------------------------------------------------------------
# In-kernel helpers
# ----------------------------------------------------------------------------
def _shift_up_down(v, is_top, is_bot):
    """Per-image reflect-padded row shifts of a lane-dense (M, C) tile.

    up[i] = v[i-1] within each image (reflected to v[i+1] at the image's top
    row); dn[i] = v[i+1] within each image (reflected to v[i-1] at the bottom).
    Pure row selection (no MXU work), so it commutes with ReLU — the kernel
    relies on relu(shift(x)) == shift(relu(x)).
    (pltpu.roll along the sublane axis is the XLU-native alternative at larger M.)
    """
    prev = jnp.concatenate([v[:1], v[:-1]], axis=0)   # v[max(i-1, 0)]
    nxt = jnp.concatenate([v[1:], v[-1:]], axis=0)    # v[min(i+1, M-1)]
    up = jnp.where(is_top, nxt, prev)
    dn = jnp.where(is_bot, prev, nxt)
    return up, dn


def _residual_conv_kernel(x_ref, wf_ref, bf_ref, w2_ref, b2_ref, o_ref, *, H):
    """Fused conv_skip + (ReLU->conv1) + (ReLU->conv2) + residual add.

    x_ref : (M, W*Cin)                M = images_per_block * H, lane-dense (W,C)
    wf_ref: (3, 2*W*Cin, 2*W*Cout)    block-diag fused [skip | conv1] kh-bands (bf16)
    bf_ref: (1, 2*W*Cout)             fused [skip | conv1] bias (f32)
    w2_ref: (3, W*Cout, W*Cout)       conv2 kh-bands (bf16)
    b2_ref: (1, W*Cout)               conv2 bias (f32)
    o_ref : (M, W*Cout)
    """
    M = x_ref.shape[0]
    Nn = o_ref.shape[-1]

    rows = jax.lax.broadcasted_iota(jnp.int32, (M, 1), 0) % H
    is_top = rows == 0
    is_bot = rows == (H - 1)

    x = x_ref[...]                                            # (M, K1) f32
    # conv_skip consumes x, conv1 consumes relu(x): concatenate along lanes so
    # a single K=2*W*Cin, N=2*W*Cout matmul per kh tap serves both convs
    # (fills the 256-wide MXU on v6e/v7x).  Operands bf16, accumulation f32.
    lhs = jnp.concatenate([x, jnp.maximum(x, 0.0)], axis=-1).astype(jnp.bfloat16)
    lhs_up, lhs_dn = _shift_up_down(lhs, is_top, is_bot)      # H reflect pad

    t = (jnp.dot(lhs_up, wf_ref[0], preferred_element_type=jnp.float32)
         + jnp.dot(lhs, wf_ref[1], preferred_element_type=jnp.float32)
         + jnp.dot(lhs_dn, wf_ref[2], preferred_element_type=jnp.float32)
         + bf_ref[...])                                       # (M, 2*Nn) f32

    y_skip = t[:, :Nn]                                        # conv_skip(x)
    z = jnp.maximum(t[:, Nn:], 0.0).astype(jnp.bfloat16)      # relu(conv1(relu(x)))
    z_up, z_dn = _shift_up_down(z, is_top, is_bot)

    y2 = (jnp.dot(z_up, w2_ref[0], preferred_element_type=jnp.float32)
          + jnp.dot(z, w2_ref[1], preferred_element_type=jnp.float32)
          + jnp.dot(z_dn, w2_ref[2], preferred_element_type=jnp.float32)
          + b2_ref[...])                                      # (M, Nn) f32

    o_ref[...] = (y2 + y_skip).astype(o_ref.dtype)            # residual add


# ----------------------------------------------------------------------------
# Wrapper-side weight preprocessing — run ONCE per parameter update and cache.
# ----------------------------------------------------------------------------
def _band_weights(w_hwio, W):
    """Fold the 3 kw taps + channel mixing + 1-px reflect pad along W of a 3x3
    conv into 3 band matrices (one per kh tap): (3, W*Cin, W*Cout), f32."""
    KH, KW, Cin, Cout = w_hwio.shape
    Wp = W + 2
    bands = []
    for kh in range(KH):
        band = jnp.zeros((Wp, Cin, W, Cout), jnp.float32)
        for kw in range(KW):
            sel = jnp.eye(Wp, W, k=-kw, dtype=jnp.float32)   # [c, j] = (c == j + kw)
            band = band + sel[:, None, :, None] * w_hwio[kh, kw][None, :, None, :]
        # Fold reflect-padded boundary columns back onto interior columns:
        #   padded col 0 -> input col 1 ; padded col W+1 -> input col W-2.
        bandu = band[1:Wp - 1]
        bandu = bandu.at[1].add(band[0])
        bandu = bandu.at[W - 2].add(band[Wp - 1])
        bands.append(bandu.reshape(W * Cin, W * Cout))
    return jnp.stack(bands)                                   # (3, W*Cin, W*Cout)


def prepare_residual_conv(params, W, *, matmul_dtype=jnp.bfloat16):
    """Fold conv weights into banded matmul form.  Cache the result across
    forward calls; only rebuild when the parameters change."""
    Cin, Cout = params["w1"].shape[2], params["w1"].shape[3]
    band1 = _band_weights(params["w1"], W)        # (3, W*Cin,  W*Cout)
    band2 = _band_weights(params["w2"], W)        # (3, W*Cout, W*Cout)
    band_s = _band_weights(params["w_skip"], W)   # (3, W*Cin,  W*Cout)

    # Block-diagonal fusion: LHS will be concat([x, relu(x)]) along lanes, so
    # one N=2*W*Cout matmul per kh tap computes conv_skip and conv1 together.
    zeros = jnp.zeros_like(band1)
    wf = jnp.concatenate(
        [jnp.concatenate([band_s, zeros], axis=2),
         jnp.concatenate([zeros, band1], axis=2)], axis=1)    # (3, 2K1, 2Nn)

    bf = jnp.concatenate([jnp.tile(params["b_skip"], W),
                          jnp.tile(params["b1"], W)]).reshape(1, 2 * W * Cout)
    b2 = jnp.tile(params["b2"], W).reshape(1, W * Cout)

    return dict(wf=wf.astype(matmul_dtype), w2=band2.astype(matmul_dtype),
                bf=bf.astype(jnp.float32), b2=b2.astype(jnp.float32),
                W=W, Cin=Cin, Cout=Cout)


# ----------------------------------------------------------------------------
# Forward pass
# ----------------------------------------------------------------------------
def _pick_images_per_block(N, H, *, row_cap=256):
    """Largest divisor of N whose row count nb*H stays sublane-aligned and
    keeps the matmul M dimension <= row_cap (amortizes MXU fill/drain and the
    per-grid-step overhead)."""
    nb = 1
    for d in range(1, N + 1):
        if N % d != 0:
            continue
        rows = d * H
        if rows > row_cap:
            break
        if rows % 8 == 0 or d == N:
            nb = d
    return nb


def residual_conv_forward_flat(x_flat, prep, *, N, H):
    """Lane-flat entry point: x_flat is (N*H, W*Cin) f32 (NHWC flattened to
    (W,C) lanes).  Keep activations in this layout across a chain of blocks to
    avoid NCHW<->NHWC transposes around every ResidualConv."""
    W, Cin, Cout = prep["W"], prep["Cin"], prep["Cout"]
    K1, Nn = W * Cin, W * Cout
    assert x_flat.shape == (N * H, K1)

    nb = _pick_images_per_block(N, H)
    m_blk = nb * H

    def const_spec(arr):
        shape = arr.shape
        return pl.BlockSpec(shape, lambda n: (0,) * len(shape))

    return pl.pallas_call(
        functools.partial(_residual_conv_kernel, H=H),
        out_shape=jax.ShapeDtypeStruct((N * H, Nn), jnp.float32),
        grid=(N // nb,),
        in_specs=[
            pl.BlockSpec((m_blk, K1), lambda n: (n, 0)),      # activations
            const_spec(prep["wf"]), const_spec(prep["bf"]),   # skip+conv1 (fused)
            const_spec(prep["w2"]), const_spec(prep["b2"]),   # conv2
        ],
        out_specs=pl.BlockSpec((m_blk, Nn), lambda n: (n, 0)),
        compiler_params=pltpu.CompilerParams(
            dimension_semantics=("parallel",)),
    )(x_flat, prep["wf"], prep["bf"], prep["w2"], prep["b2"])


def residual_conv_forward(x_nchw, prep, *, stride=1, padding=1):
    """PyTorch-layout entry point (NCHW in / NCHW out)."""
    # TODO(synk): only the stride=1, padding=1 configuration is implemented
    # (stride > 1 changes the output geometry).
    assert stride == 1 and padding == 1
    N, Cin, H, W = x_nchw.shape
    assert Cin == prep["Cin"] and W == prep["W"] and H >= 2 and W >= 2
    x_flat = jnp.transpose(x_nchw, (0, 2, 3, 1)).reshape(N * H, W * Cin)
    out_flat = residual_conv_forward_flat(x_flat, prep, N=N, H=H)
    return jnp.transpose(out_flat.reshape(N, H, W, prep["Cout"]), (0, 3, 1, 2))


# ----------------------------------------------------------------------------
# Pure-JAX reference (exact f32 lax conv) for the correctness check.
# ----------------------------------------------------------------------------
def _reflect_pad_nhwc(x, p):
    return jnp.pad(x, ((0, 0), (p, p), (p, p), (0, 0)), mode="reflect")


def _conv_ref(xp, w, b):
    y = jax.lax.conv_general_dilated(
        xp, w, window_strides=(1, 1), padding="VALID",
        dimension_numbers=("NHWC", "HWIO", "NHWC"),
        precision=jax.lax.Precision.HIGHEST)
    return y + b.reshape(1, 1, 1, -1)


def residual_conv_ref(x_nchw, params):
    x = jnp.transpose(x_nchw, (0, 2, 3, 1))
    y_skip = _conv_ref(_reflect_pad_nhwc(x, 1), params["w_skip"], params["b_skip"])
    y1 = _conv_ref(_reflect_pad_nhwc(jnp.maximum(x, 0.0), 1), params["w1"], params["b1"])
    y2 = _conv_ref(_reflect_pad_nhwc(jnp.maximum(y1, 0.0), 1), params["w2"], params["b2"])
    return jnp.transpose(y2 + y_skip, (0, 3, 1, 2))


# ----------------------------------------------------------------------------
if __name__ == "__main__":
    N, Cin, H, W = 2, 4, 16, 16
    Cout = 8
    stride, padding = 1, 1

    key = jax.random.PRNGKey(0)
    kx, k1, k2, k3, k4, k5, k6 = jax.random.split(key, 7)

    def init_conv(kw_key, kb_key, cin, cout):
        fan_in = cin * 3 * 3
        bound = 1.0 / jnp.sqrt(fan_in)
        w = jax.random.uniform(kw_key, (3, 3, cin, cout), jnp.float32, -bound, bound)
        b = jax.random.uniform(kb_key, (cout,), jnp.float32, -bound, bound)
        return w, b

    w1, b1 = init_conv(k1, k2, Cin, Cout)            # conv_block conv #1
    w2, b2 = init_conv(k3, k4, Cout, Cout)           # conv_block conv #2
    w_skip, b_skip = init_conv(k5, k6, Cin, Cout)    # conv_skip
    params = dict(w1=w1, b1=b1, w2=w2, b2=b2, w_skip=w_skip, b_skip=b_skip)

    x = jax.random.normal(kx, (N, Cin, H, W), jnp.float32)   # PyTorch NCHW input

    # Preprocess weights ONCE (per parameter update), then run the fused kernel.
    prep = prepare_residual_conv(params, W)
    fwd = jax.jit(lambda inp: residual_conv_forward(inp, prep,
                                                    stride=stride, padding=padding))

    out = jax.block_until_ready(fwd(x))

    ref = residual_conv_ref(x, params)
    assert out.shape == (N, Cout, H, W), out.shape
    # Matmul operands are bf16 (f32 accumulation), so compare against the exact
    # f32 reference with a bf16-sized tolerance.
    max_err = float(jnp.max(jnp.abs(out - ref)))
    assert jnp.allclose(out, ref, atol=3e-2, rtol=3e-2), max_err

    print("KERNEL_OK")
</pallas_src>

<mosaic_0001>
module attributes {stable_mosaic.version = 11 : i64} {
  func.func @_residual_conv_kernel(%arg0: i32, %arg1: memref<32x64xf32, #tpu.memory_space<vmem>>, %arg2: memref<3x128x256xbf16, #tpu.memory_space<vmem>>, %arg3: memref<1x256xf32, #tpu.memory_space<vmem>>, %arg4: memref<3x128x128xbf16, #tpu.memory_space<vmem>>, %arg5: memref<1x128xf32, #tpu.memory_space<vmem>>, %arg6: memref<32x128xf32, #tpu.memory_space<vmem>>) attributes {dimension_semantics = [#tpu.dimension_semantics<parallel>], iteration_bounds = array<i64: 1>, scalar_prefetch = 0 : i64, scratch_operands = 0 : i64, tpu.core_type = #tpu.core_type<tc>, window_params = [{transform_indices = @transform_0, window_bounds = array<i64: 32, 64>}, {pipeline_mode = #tpu.pipeline_mode<synchronous>, transform_indices = @transform_1, window_bounds = array<i64: 3, 128, 256>}, {pipeline_mode = #tpu.pipeline_mode<synchronous>, transform_indices = @transform_2, window_bounds = array<i64: 1, 256>}, {pipeline_mode = #tpu.pipeline_mode<synchronous>, transform_indices = @transform_3, window_bounds = array<i64: 3, 128, 128>}, {pipeline_mode = #tpu.pipeline_mode<synchronous>, transform_indices = @transform_4, window_bounds = array<i64: 1, 128>}, {transform_indices = @transform_5, window_bounds = array<i64: 32, 128>}]} {
    %0 = tpu.iota {dimensions = array<i32: 0>} : vector<32x1xi32>
    %c16_i32 = arith.constant 16 : i32
    %c0_i32 = arith.constant 0 : i32
    %1 = arith.cmpi eq, %c16_i32, %c0_i32 : i32
    %c1_i32 = arith.constant 1 : i32
    %2 = arith.select %1, %c1_i32, %c16_i32 : i32
    %3 = vector.broadcast %2 : i32 to vector<32x1xi32>
    %4 = arith.remsi %0, %3 : vector<32x1xi32>
    %c0_i32_0 = arith.constant 0 : i32
    %5 = vector.broadcast %c0_i32_0 : i32 to vector<32x1xi32>
    %6 = arith.cmpi ne, %4, %5 : vector<32x1xi32>
    %c0_i32_1 = arith.constant 0 : i32
    %7 = vector.broadcast %c0_i32_1 : i32 to vector<32x1xi32>
    %8 = arith.cmpi slt, %4, %7 : vector<32x1xi32>
    %c0_i32_2 = arith.constant 0 : i32
    %9 = arith.cmpi slt, %2, %c0_i32_2 : i32
    %10 = vector.broadcast %9 : i1 to vector<32x1xi1>
    %11 = vector.broadcast %10 : vector<32x1xi1> to vector<32x1xi1>
    %12 = arith.xori %8, %11 : vector<32x1xi1>
    %13 = arith.andi %12, %6 : vector<32x1xi1>
    %14 = vector.broadcast %2 : i32 to vector<32x1xi32>
    %15 = arith.addi %4, %14 : vector<32x1xi32>
    %16 = arith.select %13, %15, %4 : vector<32x1xi1>, vector<32x1xi32>
    %c0_i32_3 = arith.constant 0 : i32
    %17 = vector.broadcast %c0_i32_3 : i32 to vector<32x1xi32>
    %18 = arith.cmpi eq, %16, %17 : vector<32x1xi32>
    %c15_i32 = arith.constant 15 : i32
    %19 = vector.broadcast %c15_i32 : i32 to vector<32x1xi32>
    %20 = arith.cmpi eq, %16, %19 : vector<32x1xi32>
    %c0 = arith.constant 0 : index
    %c0_4 = arith.constant 0 : index
    %21 = vector.load %arg1[%c0, %c0_4] : memref<32x64xf32, #tpu.memory_space<vmem>>, vector<32x64xf32>
    %cst = arith.constant 0.000000e+00 : f32
    %22 = vector.broadcast %cst : f32 to vector<32x64xf32>
    %23 = arith.maximumf %21, %22 : vector<32x64xf32>
    %24 = tpu.concatenate %21, %23 in 1 : vector<32x64xf32>, vector<32x64xf32> -> vector<32x128xf32>
    %25 = arith.truncf %24 : vector<32x128xf32> to vector<32x128xbf16>
    %26 = vector.extract_strided_slice %25 {offsets = [0, 0], sizes = [1, 128], strides = [1, 1]} : vector<32x128xbf16> to vector<1x128xbf16>
    %27 = vector.extract_strided_slice %25 {offsets = [0, 0], sizes = [31, 128], strides = [1, 1]} : vector<32x128xbf16> to vector<31x128xbf16>
    %28 = tpu.concatenate %26, %27 in 0 : vector<1x128xbf16>, vector<31x128xbf16> -> vector<32x128xbf16>
    %29 = vector.extract_strided_slice %25 {offsets = [1, 0], sizes = [31, 128], strides = [1, 1]} : vector<32x128xbf16> to vector<31x128xbf16>
    %30 = vector.extract_strided_slice %25 {offsets = [31, 0], sizes = [1, 128], strides = [1, 1]} : vector<32x128xbf16> to vector<1x128xbf16>
    %31 = tpu.concatenate %29, %30 in 0 : vector<31x128xbf16>, vector<1x128xbf16> -> vector<32x128xbf16>
    %32 = vector.shape_cast %18 : vector<32x1xi1> to vector<32x1xi1>
    %33 = vector.broadcast %32 : vector<32x1xi1> to vector<32x128xi1>
    %34 = arith.select %33, %31, %28 : vector<32x128xi1>, vector<32x128xbf16>
    %35 = vector.shape_cast %20 : vector<32x1xi1> to vector<32x1xi1>
    %36 = vector.broadcast %35 : vector<32x1xi1> to vector<32x128xi1>
    %37 = arith.select %36, %28, %31 : vector<32x128xi1>, vector<32x128xbf16>
    %c0_5 = arith.constant 0 : index
    %c0_6 = arith.constant 0 : index
    %c0_7 = arith.constant 0 : index
    %38 = vector.load %arg2[%c0_5, %c0_6, %c0_7] : memref<3x128x256xbf16, #tpu.memory_space<vmem>>, vector<1x128x256xbf16>
    %39 = vector.shape_cast %38 : vector<1x128x256xbf16> to vector<128x256xbf16>
    %cst_8 = arith.constant dense<0.000000e+00> : vector<32x256xf32>
    %40 = tpu.matmul %34, %39, %cst_8 {dimension_numbers = #tpu.dot_dimension_numbers<[1], [0], [0], [1], [0, 0, 1, 1], [], []>} : vector<32x128xbf16>, vector<128x256xbf16>, vector<32x256xf32> -> vector<32x256xf32>
    %c1 = arith.constant 1 : index
    %c0_9 = arith.constant 0 : index
    %c0_10 = arith.constant 0 : index
    %41 = vector.load %arg2[%c1, %c0_9, %c0_10] : memref<3x128x256xbf16, #tpu.memory_space<vmem>>, vector<1x128x256xbf16>
    %42 = vector.shape_cast %41 : vector<1x128x256xbf16> to vector<128x256xbf16>
    %cst_11 = arith.constant dense<0.000000e+00> : vector<32x256xf32>
    %43 = tpu.matmul %25, %42, %cst_11 {dimension_numbers = #tpu.dot_dimension_numbers<[1], [0], [0], [1], [0, 0, 1, 1], [], []>} : vector<32x128xbf16>, vector<128x256xbf16>, vector<32x256xf32> -> vector<32x256xf32>
    %44 = arith.addf %40, %43 : vector<32x256xf32>
    %c2 = arith.constant 2 : index
    %c0_12 = arith.constant 0 : index
    %c0_13 = arith.constant 0 : index
    %45 = vector.load %arg2[%c2, %c0_12, %c0_13] : memref<3x128x256xbf16, #tpu.memory_space<vmem>>, vector<1x128x256xbf16>
    %46 = vector.shape_cast %45 : vector<1x128x256xbf16> to vector<128x256xbf16>
    %cst_14 = arith.constant dense<0.000000e+00> : vector<32x256xf32>
    %47 = tpu.matmul %37, %46, %cst_14 {dimension_numbers = #tpu.dot_dimension_numbers<[1], [0], [0], [1], [0, 0, 1, 1], [], []>} : vector<32x128xbf16>, vector<128x256xbf16>, vector<32x256xf32> -> vector<32x256xf32>
    %48 = arith.addf %44, %47 : vector<32x256xf32>
    %c0_15 = arith.constant 0 : index
    %c0_16 = arith.constant 0 : index
    %49 = vector.load %arg3[%c0_15, %c0_16] : memref<1x256xf32, #tpu.memory_space<vmem>>, vector<1x256xf32>
    %50 = vector.broadcast %49 : vector<1x256xf32> to vector<32x256xf32>
    %51 = arith.addf %48, %50 : vector<32x256xf32>
    %52 = vector.extract_strided_slice %51 {offsets = [0, 0], sizes = [32, 128], strides = [1, 1]} : vector<32x256xf32> to vector<32x128xf32>
    %53 = vector.extract_strided_slice %51 {offsets = [0, 128], sizes = [32, 128], strides = [1, 1]} : vector<32x256xf32> to vector<32x128xf32>
    %cst_17 = arith.constant 0.000000e+00 : f32
    %54 = vector.broadcast %cst_17 : f32 to vector<32x128xf32>
    %55 = arith.maximumf %53, %54 : vector<32x128xf32>
    %56 = arith.truncf %55 : vector<32x128xf32> to vector<32x128xbf16>
    %57 = vector.extract_strided_slice %56 {offsets = [0, 0], sizes = [1, 128], strides = [1, 1]} : vector<32x128xbf16> to vector<1x128xbf16>
    %58 = vector.extract_strided_slice %56 {offsets = [0, 0], sizes = [31, 128], strides = [1, 1]} : vector<32x128xbf16> to vector<31x128xbf16>
    %59 = tpu.concatenate %57, %58 in 0 : vector<1x128xbf16>, vector<31x128xbf16> -> vector<32x128xbf16>
    %60 = vector.extract_strided_slice %56 {offsets = [1, 0], sizes = [31, 128], strides = [1, 1]} : vector<32x128xbf16> to vector<31x128xbf16>
    %61 = vector.extract_strided_slice %56 {offsets = [31, 0], sizes = [1, 128], strides = [1, 1]} : vector<32x128xbf16> to vector<1x128xbf16>
    %62 = tpu.concatenate %60, %61 in 0 : vector<31x128xbf16>, vector<1x128xbf16> -> vector<32x128xbf16>
    %63 = vector.shape_cast %18 : vector<32x1xi1> to vector<32x1xi1>
    %64 = vector.broadcast %63 : vector<32x1xi1> to vector<32x128xi1>
    %65 = arith.select %64, %62, %59 : vector<32x128xi1>, vector<32x128xbf16>
    %66 = vector.shape_cast %20 : vector<32x1xi1> to vector<32x1xi1>
    %67 = vector.broadcast %66 : vector<32x1xi1> to vector<32x128xi1>
    %68 = arith.select %67, %59, %62 : vector<32x128xi1>, vector<32x128xbf16>
    %c0_18 = arith.constant 0 : index
    %c0_19 = arith.constant 0 : index
    %c0_20 = arith.constant 0 : index
    %69 = vector.load %arg4[%c0_18, %c0_19, %c0_20] : memref<3x128x128xbf16, #tpu.memory_space<vmem>>, vector<1x128x128xbf16>
    %70 = vector.shape_cast %69 : vector<1x128x128xbf16> to vector<128x128xbf16>
    %cst_21 = arith.constant dense<0.000000e+00> : vector<32x128xf32>
    %71 = tpu.matmul %65, %70, %cst_21 {dimension_numbers = #tpu.dot_dimension_numbers<[1], [0], [0], [1], [0, 0, 1, 1], [], []>} : vector<32x128xbf16>, vector<128x128xbf16>, vector<32x128xf32> -> vector<32x128xf32>
    %c1_22 = arith.constant 1 : index
    %c0_23 = arith.constant 0 : index
    %c0_24 = arith.constant 0 : index
    %72 = vector.load %arg4[%c1_22, %c0_23, %c0_24] : memref<3x128x128xbf16, #tpu.memory_space<vmem>>, vector<1x128x128xbf16>
    %73 = vector.shape_cast %72 : vector<1x128x128xbf16> to vector<128x128xbf16>
    %cst_25 = arith.constant dense<0.000000e+00> : vector<32x128xf32>
    %74 = tpu.matmul %56, %73, %cst_25 {dimension_numbers = #tpu.dot_dimension_numbers<[1], [0], [0], [1], [0, 0, 1, 1], [], []>} : vector<32x128xbf16>, vector<128x128xbf16>, vector<32x128xf32> -> vector<32x128xf32>
    %75 = arith.addf %71, %74 : vector<32x128xf32>
    %c2_26 = arith.constant 2 : index
    %c0_27 = arith.constant 0 : index
    %c0_28 = arith.constant 0 : index
    %76 = vector.load %arg4[%c2_26, %c0_27, %c0_28] : memref<3x128x128xbf16, #tpu.memory_space<vmem>>, vector<1x128x128xbf16>
    %77 = vector.shape_cast %76 : vector<1x128x128xbf16> to vector<128x128xbf16>
    %cst_29 = arith.constant dense<0.000000e+00> : vector<32x128xf32>
    %78 = tpu.matmul %68, %77, %cst_29 {dimension_numbers = #tpu.dot_dimension_numbers<[1], [0], [0], [1], [0, 0, 1, 1], [], []>} : vector<32x128xbf16>, vector<128x128xbf16>, vector<32x128xf32> -> vector<32x128xf32>
    %79 = arith.addf %75, %78 : vector<32x128xf32>
    %c0_30 = arith.constant 0 : index
    %c0_31 = arith.constant 0 : index
    %80 = vector.load %arg5[%c0_30, %c0_31] : memref<1x128xf32, #tpu.memory_space<vmem>>, vector<1x128xf32>
    %81 = vector.broadcast %80 : vector<1x128xf32> to vector<32x128xf32>
    %82 = arith.addf %79, %81 : vector<32x128xf32>
    %83 = arith.addf %82, %52 : vector<32x128xf32>
    %c0_32 = arith.constant 0 : index
    %c0_33 = arith.constant 0 : index
    %84 = vector.load %arg6[%c0_32, %c0_33] : memref<32x128xf32, #tpu.memory_space<vmem>>, vector<32x128xf32>
    tpu.vector_store %arg6[%c0_32, %c0_33], %83 {strides = array<i32>} : memref<32x128xf32, #tpu.memory_space<vmem>>, vector<32x128xf32>,
    return
  }
  func.func @transform_0(%arg0: i32) -> (i32, i32) {
    %c0_i32 = arith.constant 0 : i32
    %c0_i32_0 = arith.constant 0 : i32
    return %arg0, %c0_i32 : i32, i32
  }
  func.func @transform_1(%arg0: i32) -> (i32, i32, i32) {
    %c0_i32 = arith.constant 0 : i32
    %c0_i32_0 = arith.constant 0 : i32
    %c0_i32_1 = arith.constant 0 : i32
    %c0_i32_2 = arith.constant 0 : i32
    return %c0_i32, %c0_i32_0, %c0_i32_1 : i32, i32, i32
  }
  func.func @transform_2(%arg0: i32) -> (i32, i32) {
    %c0_i32 = arith.constant 0 : i32
    %c0_i32_0 = arith.constant 0 : i32
    %c0_i32_1 = arith.constant 0 : i32
    return %c0_i32, %c0_i32_0 : i32, i32
  }
  func.func @transform_3(%arg0: i32) -> (i32, i32, i32) {
    %c0_i32 = arith.constant 0 : i32
    %c0_i32_0 = arith.constant 0 : i32
    %c0_i32_1 = arith.constant 0 : i32
    %c0_i32_2 = arith.constant 0 : i32
    return %c0_i32, %c0_i32_0, %c0_i32_1 : i32, i32, i32
  }
  func.func @transform_4(%arg0: i32) -> (i32, i32) {
    %c0_i32 = arith.constant 0 : i32
    %c0_i32_0 = arith.constant 0 : i32
    %c0_i32_1 = arith.constant 0 : i32
    return %c0_i32, %c0_i32_0 : i32, i32
  }
  func.func @transform_5(%arg0: i32) -> (i32, i32) {
    %c0_i32 = arith.constant 0 : i32
    %c0_i32_0 = arith.constant 0 : i32
    return %arg0, %c0_i32 : i32, i32
  }
}

</mosaic_0001>

<bundles_post_ra>
// kernel: _lambda_.1
= control target key start
LH: loop header
LB: loop body
LE: loop exit
PB: predicated region body
PF: predicated region fallthrough
CT: control target
= control target key end

     0   :  { %v1444_v3 = vmov 0   ;;  %vm108_vm0 = vcmask 523264   ;;  %v23_v47 = vlaneseq  ;;  %vm1446_vm3 = vmmov 0   ;;  %s1864_s0 = inlined_call_operand.vmem [shape: f32[32,64], index: 0, kind: input, shape index: {}]   ;;  %s1865_s1 = inlined_call_operand.vmem [shape: bf16[3,128,256], index: 1, kind: input, shape index: {}]   ;;  %s1866_s3 = inlined_call_operand.vmem [shape: bf16[3,128,128], index: 3, kind: input, shape index: {}]   ;;  %s1867_s2 = inlined_call_operand.vmem [shape: f32[1,256], index: 2, kind: input, shape index: {}]   ;;  %s1868_s4 = inlined_call_operand.vmem [shape: f32[1,128], index: 4, kind: input, shape index: {}]   ;;  %s1869_s5 = inlined_call_operand.vmem [shape: f32[32,128], index: 5, kind: output, shape index: {}]  }
   0x1   :  { %v1480_v0 = vld [vmem:[%s1864_s0] sm:$0xff]  ;;  %v1485_v1 = vld [vmem:[%s1864_s0 + $0x8] sm:$0xff]  ;;  %v1490_v2 = vld [vmem:[%s1864_s0 + $0x10] sm:$0xff]  ;;  %344 = vmatprep.mubr.bf16.mxu0 %v1444_v3  ;;  %vm115_vm5 = vsmask.f32 256  ;;  %vm133_vm7 = vcmask 1040384  }
   0x2   :  { %v88_v4 = vmax.f32 %v1480_v0, 0.0  ;;  %v89_v5 = vmax.f32 %v1485_v1, 0.0  ;;  %v1498_v6 = vld [vmem:[%s1864_s0 + $0x18] sm:$0xff]  ;;  %v90_v7 = vmax.f32 %v1490_v2, 0.0  ;;  %v1348_v9 = vld [vmem:[%s1865_s1 + $0x84] ss:$8 sps:$4 sm:$0xff]   ;;  %vm156_vm4 = vmpackc.low %vm1446_vm3, %vm1446_vm3 }
   0x3   :  { %v91_v8 = vmax.f32 %v1498_v6, 0.0  ;;  %v1350_v10 = vld [vmem:[%s1865_s1 + $0x80] ss:$8 sps:$4 sm:$0xff]   ;;  %v1351_v12 = vld [vmem:[%s1865_s1 + $0x94] ss:$8 sps:$4 sm:$0xff]   ;;  %312 = vmatprep.subr.bf16.mxu0 %v1348_v9  ;;  %s1445_s0 = smov 64   ;;  %vm1657_vm10 = vmand %vm133_vm7, %vm115_vm5 }
   0x4   :  { %v1338_v11 = vpack.i.bf16 %v89_v5, %v88_v4  ;;  %313 = vmatpush1.bf16.msra.mxu0 %v1350_v10  ;;  %v1353_v14 = vld [vmem:[%s1865_s1 + $0x90] ss:$8 sps:$4 sm:$0xff]   ;;  %v1354_v15 = vld [vmem:[%s1865_s1 + $0xa4] ss:$8 sps:$4 sm:$0xff]   ;;  %v1356_v16 = vld [vmem:[%s1865_s1 + $0xa0] ss:$8 sps:$4 sm:$0xff]  }
   0x5   :  { %v1343_v13 = vpack.i.bf16 %v91_v8, %v90_v7  ;;  %314 = vmatprep.subr.bf16.mxu0 %v1351_v12  ;;  %v1357_v17 = vld [vmem:[%s1865_s1 + $0xb4] ss:$8 sps:$4 sm:$0xff]   ;;  %v1359_v18 = vld [vmem:[%s1865_s1 + $0xb0] ss:$8 sps:$4 sm:$0xff]   ;;  %v1360_v19 = vld [vmem:[%s1865_s1 + $0xc4] ss:$8 sps:$4 sm:$0xff]  }
   0x6   :  { %1339 = vrot.lane.b32.xlu0 %v1338_v11, %s1445_s0  ;;  %v1362_v20 = vld [vmem:[%s1865_s1 + $0xc0] ss:$8 sps:$4 sm:$0xff]   ;;  %v1363_v21 = vld [vmem:[%s1865_s1 + $0xd4] ss:$8 sps:$4 sm:$0xff]   ;;  %v1365_v22 = vld [vmem:[%s1865_s1 + $0xd0] ss:$8 sps:$4 sm:$0xff]  }
   0x7   :  { %v1366_v23 = vld [vmem:[%s1865_s1 + $0xe4] ss:$8 sps:$4 sm:$0xff]   ;;  %v1368_v24 = vld [vmem:[%s1865_s1 + $0xe0] ss:$8 sps:$4 sm:$0xff]   ;;  %v1369_v25 = vld [vmem:[%s1865_s1 + $0xf4] ss:$8 sps:$4 sm:$0xff]  }
   0x8   :  { %315 = vmatpush1.bf16.msra.mxu0 %v1353_v14  ;;  %v1371_v26 = vld [vmem:[%s1865_s1 + $0xf0] ss:$8 sps:$4 sm:$0xff]   ;;  %v1374_v27 = vld [vmem:[%s1865_s1 + $0x4] ss:$8 sps:$4 sm:$0xff]   ;;  %v1372_v37 = vld [vmem:[%s1865_s1] ss:$8 sps:$4 sm:$0xff]  }
   0x9   :  { %316 = vmatprep.subr.bf16.mxu0 %v1354_v15  ;;  %v1420_v28 = vld [vmem:[%s1866_s3 + $0x40] sm:$0xff]   ;;  %v1421_v29 = vld [vmem:[%s1866_s3 + $0x48] sm:$0xff]   ;;  %v1422_v30 = vld [vmem:[%s1866_s3 + $0x50] sm:$0xff]   ;;  %v1598_v51 = vshrl.u32 %v23_v47, 7  ;;  %v1636_v4 = vsel %vm156_vm4, 65537, %v1444_v3  ;;  %vm144_vm12 = vcmask 1047552  }
   0xa   :  { %1344 = vrot.lane.b32.xlu0 %v1343_v13, %s1445_s0  ;;  %1251 = vmatprep.subr.bf16.mxu1 %v1420_v28  ;;  %v1423_v31 = vld [vmem:[%s1866_s3 + $0x58] sm:$0xff]   ;;  %v1380_v44 = vld [vmem:[%s1865_s1 + $0x24] ss:$8 sps:$4 sm:$0xff]   ;;  %v1378_v48 = vld [vmem:[%s1865_s1 + $0x20] ss:$8 sps:$4 sm:$0xff]  }
   0xb   :  { %1252 = vmatpush3.bf16.msra.mxu1 %v1420_v28  ;;  %v1377_v40 = vld [vmem:[%s1865_s1 + $0x14] ss:$8 sps:$4 sm:$0xff]   ;;  %v1375_v43 = vld [vmem:[%s1865_s1 + $0x10] ss:$8 sps:$4 sm:$0xff]   ;;  %v1386_v53 = vld [vmem:[%s1865_s1 + $0x44] ss:$8 sps:$4 sm:$0xff]  }
   0xc   :  { %317 = vmatpush1.bf16.msra.mxu0 %v1356_v16  ;;  %1253 = vmatprep.subr.bf16.mxu1 %v1421_v29  ;;  %v1383_v50 = vld [vmem:[%s1865_s1 + $0x34] ss:$8 sps:$4 sm:$0xff]   ;;  %v1381_v52 = vld [vmem:[%s1865_s1 + $0x30] ss:$8 sps:$4 sm:$0xff]   ;;  %v32_v54 = vand.u32 15, %v1598_v51  ;;  %v26_v58 = vadd.s32 16, %v1598_v51 }
   0xd   :  { %318 = vmatprep.subr.bf16.mxu0 %v1357_v17  ;;  %v1384_v55 = vld [vmem:[%s1865_s1 + $0x40] ss:$8 sps:$4 sm:$0xff]   ;;  %v1389_v56 = vld [vmem:[%s1865_s1 + $0x54] ss:$8 sps:$4 sm:$0xff]   ;;  %v1387_v59 = vld [vmem:[%s1865_s1 + $0x50] ss:$8 sps:$4 sm:$0xff]  }
   0xe   :  { %vm1614_vm1 = vcmp.eq.s32.totalorder %v32_v54, 0  ;;  %v1392_v60 = vld [vmem:[%s1865_s1 + $0x64] ss:$8 sps:$4 sm:$0xff]   ;;  %v46_v63 = vand.u32 15, %v26_v58  ;;  %v1395_v5 = vld [vmem:[%s1865_s1 + $0x74] ss:$8 sps:$4 sm:$0xff]  }
   0xf   :  { %1254 = vmatpush3.bf16.msra.mxu1 %v1421_v29  ;;  %vm155_vm2 = vmpackc.low %vm1614_vm1, %vm1614_vm1  ;;  %v1393_v12 = vld [vmem:[%s1865_s1 + $0x70] ss:$8 sps:$4 sm:$0xff]   ;;  %vm136_vm8 = vsmask.f32 7424  ;;  %v1398_v15 = vld [vmem:[%s1865_s1 + $0x104] ss:$8 sps:$4 sm:$0xff]  }
  0x10   :  { %319 = vmatpush1.bf16.msra.mxu0 %v1359_v18  ;;  %1255 = vmatprep.subr.bf16.mxu1 %v1422_v30  ;;  %vm1641_vm6 = vcmp.eq.s32.totalorder %v46_v63, 0  ;;  %v1399_v28 = vld [vmem:[%s1865_s1 + $0x110] ss:$8 sps:$4 sm:$0xff]   ;;  %vm1687_vm13 = vmand %vm144_vm12, %vm136_vm8  ;;  %v1414_v47 = vld [vmem:[%s1865_s1 + $0x160] ss:$8 sps:$4 sm:$0xff]   ;;  %v660_v63 = vsub.s32 0, %v1598_v51 }
  0x11   :  { %320 = vmatprep.subr.bf16.mxu0 %v1360_v19  ;;  %vm157_vm9 = vmpackc.low %vm1641_vm6, %vm1641_vm6  ;;  %v1434_v29 = vld [vmem:[%s1866_s3 + $0x30] sm:$0xff]   ;;  %v1439_v57 = vld [vmem:[%s1866_s3 + $0x98] sm:$0xff]  }
  0x13   :  { %1256 = vmatpush3.bf16.msra.mxu1 %v1422_v30  ;;  %v1404_v30 = vld [vmem:[%s1865_s1 + $0x124] ss:$8 sps:$4 sm:$0xff]  }
  0x14   :  { %321 = vmatpush1.bf16.msra.mxu0 %v1362_v20  ;;  %1257 = vmatprep.subr.bf16.mxu1 %v1423_v31  ;;  %v1396_v20 = vld [vmem:[%s1865_s1 + $0x100] ss:$8 sps:$4 sm:$0xff]  }
  0x15   :  { %322 = vmatprep.subr.bf16.mxu0 %v1363_v21  ;;  %v161_v21 = vsel %vm157_vm9, 65537, %v1444_v3 }
  0x17   :  { %1258 = vmatpush3.bf16.msra.mxu1 %v1423_v31 }
  0x18   :  { %323 = vmatpush1.bf16.msra.mxu0 %v1365_v22 }
  0x19   :  { %324 = vmatprep.subr.bf16.mxu0 %v1366_v23  ;;  %v1401_v23 = vld [vmem:[%s1865_s1 + $0x114] ss:$8 sps:$4 sm:$0xff]  }
  0x1c   :  { %325 = vmatpush1.bf16.msra.mxu0 %v1368_v24 }
  0x1d   :  { %326 = vmatprep.subr.bf16.mxu0 %v1369_v25 }
  0x20   :  { %327 = vmatpush1.bf16.msra.mxu0 %v1371_v26 }
  0x21   :  { %445 = vmatprep.subr.bf16.mxu0 %v1374_v27  ;;  %v1081_v27 = vcombine.low %v161_v21, %v1636_v4 }
  0x23   :  { %vm1698_vm14 = vcmp.ne.s16.totalorder %v1081_v27, 0 }
  0x78   :  { %v1340_v32 = vpop.permute.xlu0 %1339 }
  0x79   :  { %v1342_v33 = vunpack.i.h.bf16 %v1340_v32  ;;  %v1341_v34 = vunpack.i.l.bf16 %v1340_v32 }
  0x7b   :  { %v110_v35 = vsel %vm108_vm0, %v1485_v1, %v1342_v33  ;;  %v109_v36 = vsel %vm108_vm0, %v1480_v0, %v1341_v34  ;;  %v1390_v1 = vld [vmem:[%s1865_s1 + $0x60] ss:$8 sps:$4 sm:$0xff]   ;;  %v1435_v33 = vld [vmem:[%s1866_s3 + $0x38] sm:$0xff]  }
  0x7c   :  { %v1572_v38 = vpack.c.bf16 %v110_v35, %v109_v36  ;;  %v1345_v39 = vpop.permute.xlu0 %1344  ;;  %v1402_v34 = vld [vmem:[%s1865_s1 + $0x120] ss:$8 sps:$4 sm:$0xff]   ;;  %v1407_v35 = vld [vmem:[%s1865_s1 + $0x134] ss:$8 sps:$4 sm:$0xff]  }
  0x7d   :  { %v1347_v41 = vunpack.i.h.bf16 %v1345_v39  ;;  %v1346_v42 = vunpack.i.l.bf16 %v1345_v39  ;;  %v1410_v39 = vld [vmem:[%s1865_s1 + $0x144] ss:$8 sps:$4 sm:$0xff]  }
  0x7e   :  { %345 = vmatmul.mubr.bf16.vlgmr.msra.gmra.mrb[0].mxu0 %v1572_v38  ;;  %v117_v61 = vshrl.u32 %v1572_v38, 16  ;;  %v120_v62 = vshll.u32 %v1572_v38, 16 }
  0x7f   :  { %446 = vmatpush1.bf16.msra.mxu0 %v1372_v37  ;;  %354 = vmatprep.mubr.bf16.mxu0 %v1444_v3  ;;  %v112_v45 = vsel %vm108_vm0, %v1498_v6, %v1347_v41  ;;  %v111_v46 = vsel %vm108_vm0, %v1490_v2, %v1346_v42  ;;  %v159_v2 = vsel %vm155_vm2, 65537, %v1444_v3  ;;  %v25_v37 = vadd.s32 8, %v1598_v51  ;;  %v1408_v41 = vld [vmem:[%s1865_s1 + $0x140] ss:$8 sps:$4 sm:$0xff]   ;;  %v1413_v42 = vld [vmem:[%s1865_s1 + $0x154] ss:$8 sps:$4 sm:$0xff]  }
  0x80   :  { %447 = vmatprep.subr.bf16.mxu0 %v1377_v40  ;;  %v1592_v49 = vpack.c.bf16 %v112_v45, %v111_v46  ;;  %v119_v6 = vrot.slane %v117_v61, 7  ;;  %v137_v7 = vrot.slane %v120_v62, 1  ;;  %v1080_v10 = vcombine.low %v159_v2, %v1636_v4  ;;  %v1416_v45 = vld [vmem:[%s1865_s1 + $0x164] ss:$8 sps:$4 sm:$0xff]  }
  0x81   :  { %v39_v40 = vand.u32 15, %v25_v37 }
  0x82   :  { %v127_v0 = vshll.u32 %v1592_v49, 16  ;;  %v124_v11 = vshrl.u32 %v1592_v49, 16  ;;  %v122_v13 = vor.u32 %v120_v62, %v119_v6  ;;  %v138_v14 = vor.u32 %v137_v7, %v117_v61  ;;  %v1427_v61 = vld [vmem:[%s1866_s3 + $0x78] sm:$0xff]   ;;  %v1428_v62 = vld [vmem:[%s1866_s3] sm:$0xff]  }
  0x83   :  { %448 = vmatpush1.bf16.msra.mxu0 %v1375_v43  ;;  %vm1664_vm11 = vcmp.ne.s16.totalorder %v1080_v10, 0  ;;  %vm81_vm15 = vcmp.eq.s32.totalorder %v39_v40, 15  ;;  %v27_v43 = vadd.s32 24, %v1598_v51  ;;  %v1430_v40 = vld [vmem:[%s1866_s3 + $0x10] sm:$0xff]  }
  0x84   :  { %449 = vmatprep.subr.bf16.mxu0 %v1380_v44  ;;  %v139_v9 = vrot.slane %v127_v0, 1  ;;  %v126_v19 = vrot.slane %v124_v11, 7  ;;  %v135_v22 = vsel %vm1657_vm10, %v1572_v38, %v122_v13  ;;  %v1405_v38 = vld [vmem:[%s1865_s1 + $0x130] ss:$8 sps:$4 sm:$0xff]   ;;  %vm182_vm0 = vmpackc.low %vm81_vm15, %vm81_vm15 }
  0x85   :  { %v1411_v44 = vld [vmem:[%s1865_s1 + $0x150] ss:$8 sps:$4 sm:$0xff]   ;;  %v53_v46 = vand.u32 15, %v27_v43 }
  0x86   :  { %355 = vmatmul.mubr.bf16.gmra.mrb[4].mxu0 %v1592_v49  ;;  %v1662_v17 = vsel %vm136_vm8, %v138_v14, %v139_v9  ;;  %v129_v25 = vor.u32 %v127_v0, %v126_v19  ;;  %v141_v26 = vor.u32 %v139_v9, %v124_v11  ;;  %v656_v0 = vld [vmem:[%s1867_s2] sm:$0x3] }
  0x87   :  { %450 = vmatpush1.bf16.msra.mxu0 %v1378_v48  ;;  %477 = vmatprep.mubr.bf16.mxu0 %v1444_v3  ;;  %v171_v24 = vsel %vm1664_vm11, %v1662_v17, %v135_v22  ;;  %v186_v48 = vsel %vm182_vm0, 65537, %v1444_v3  ;;  %vm83_vm1 = vcmp.eq.s32.totalorder %v53_v46, 15  ;;  %v661_v2 = vrot.slane %v656_v0, %v660_v63 }
  0x88   :  { %451 = vmatprep.subr.bf16.mxu0 %v1383_v50  ;;  %v130_v31 = vsel %vm115_vm5, %v119_v6, %v129_v25  ;;  %v146_v32 = vsel %vm1687_vm13, %v141_v26, %v1592_v49  ;;  %v1419_v49 = vld [vmem:[%s1865_s1 + $0x174] ss:$8 sps:$4 sm:$0xff]   ;;  %v1082_v50 = vcombine.low %v1636_v4, %v186_v48  ;;  %vm184_vm2 = vmpackc.low %vm83_vm1, %vm83_vm1 }
  0x89   :  { %v172_v36 = vsel %vm1698_vm14, %v146_v32, %v130_v31  ;;  %v188_v54 = vsel %vm184_vm2, 65537, %v1444_v3  ;;  %v1431_v48 = vld [vmem:[%s1866_s3 + $0x18] sm:$0xff]  }
  0x8a   :  { %vm1742_vm3 = vcmp.ne.s16.totalorder %v1082_v50, 0 }
  0x8b   :  { %452 = vmatpush1.bf16.msra.mxu0 %v1381_v52  ;;  %v1417_v52 = vld [vmem:[%s1865_s1 + $0x170] ss:$8 sps:$4 sm:$0xff]  }
  0x8c   :  { %453 = vmatprep.subr.bf16.mxu0 %v1386_v53  ;;  %v1433_v53 = vld [vmem:[%s1866_s3 + $0x28] sm:$0xff]  }
  0x8f   :  { %454 = vmatpush1.bf16.msra.mxu0 %v1384_v55  ;;  %v197_v55 = vsel %vm1742_vm3, %v135_v22, %v1662_v17 }
  0x90   :  { %455 = vmatprep.subr.bf16.mxu0 %v1389_v56  ;;  %v1083_v56 = vcombine.low %v1636_v4, %v188_v54  ;;  %v1436_v54 = vld [vmem:[%s1866_s3 + $0x80] sm:$0xff]  }
  0x92   :  { %vm1752_vm4 = vcmp.ne.s16.totalorder %v1083_v56, 0  ;;  %v1438_v56 = vld [vmem:[%s1866_s3 + $0x90] sm:$0xff]  }
  0x93   :  { %456 = vmatpush1.bf16.msra.mxu0 %v1387_v59  ;;  %v198_v58 = vsel %vm1752_vm4, %v130_v31, %v146_v32  ;;  %v1424_v59 = vld [vmem:[%s1866_s3 + $0x60] sm:$0xff]   ;;  %v1429_v32 = vld [vmem:[%s1866_s3 + $0x8] sm:$0xff]  }
  0x94   :  { %457 = vmatprep.subr.bf16.mxu0 %v1392_v60  ;;  %1259 = vmatprep.subr.bf16.mxu1 %v1424_v59  ;;  %v1425_v60 = vld [vmem:[%s1866_s3 + $0x68] sm:$0xff]  }
  0x95   :  { %1260 = vmatpush3.bf16.msra.mxu1 %v1424_v59  ;;  %v1441_v59 = vld [vmem:[%s1866_s3 + $0xa8] sm:$0xff]  }
  0x96   :  { %1261 = vmatprep.subr.bf16.mxu1 %v1425_v60 }
  0x97   :  { %458 = vmatpush1.bf16.msra.mxu0 %v1390_v1  ;;  %v664_v1 = vsub.s32 1, %v1598_v51 }
  0x98   :  { %459 = vmatprep.subr.bf16.mxu0 %v1395_v5 }
  0x99   :  { %1262 = vmatpush3.bf16.msra.mxu1 %v1425_v60  ;;  %v665_v4 = vrot.slane %v656_v0, %v664_v1  ;;  %v1442_v60 = vld [vmem:[%s1866_s3 + $0xb0] sm:$0xff]  }
  0x9b   :  { %460 = vmatpush1.bf16.msra.mxu0 %v1393_v12 }
  0x9c   :  { %595 = vmatprep.subr.bf16.mxu0 %v1398_v15 }
  0x9e   :  { %478 = vmatmul.mubr.bf16.vlgmr.msra.gmra.mrb[0].mxu0 %v171_v24 }
  0x9f   :  { %596 = vmatpush1.bf16.msra.mxu0 %v1396_v20  ;;  %487 = vmatprep.mubr.bf16.mxu0 %v1444_v3 }
  0xa0   :  { %597 = vmatprep.subr.bf16.mxu0 %v1401_v23 }
  0xa3   :  { %598 = vmatpush1.bf16.msra.mxu0 %v1399_v28 }
  0xa4   :  { %599 = vmatprep.subr.bf16.mxu0 %v1404_v30 }
  0xa6   :  { %488 = vmatmul.mubr.bf16.gmra.mrb[4].mxu0 %v172_v36 }
  0xa7   :  { %600 = vmatpush1.bf16.msra.mxu0 %v1402_v34  ;;  %627 = vmatprep.mubr.bf16.mxu0 %v1444_v3 }
  0xa8   :  { %601 = vmatprep.subr.bf16.mxu0 %v1407_v35 }
  0xab   :  { %602 = vmatpush1.bf16.msra.mxu0 %v1405_v38 }
  0xac   :  { %603 = vmatprep.subr.bf16.mxu0 %v1410_v39 }
  0xaf   :  { %604 = vmatpush1.bf16.msra.mxu0 %v1408_v41 }
  0xb0   :  { %605 = vmatprep.subr.bf16.mxu0 %v1413_v42 }
  0xb3   :  { %606 = vmatpush1.bf16.msra.mxu0 %v1411_v44 }
  0xb4   :  { %607 = vmatprep.subr.bf16.mxu0 %v1416_v45 }
  0xb7   :  { %608 = vmatpush1.bf16.msra.mxu0 %v1414_v47 }
  0xb8   :  { %609 = vmatprep.subr.bf16.mxu0 %v1419_v49 }
  0xbb   :  { %610 = vmatpush1.bf16.msra.mxu0 %v1417_v52  ;;  %v1432_v52 = vld [vmem:[%s1866_s3 + $0x20] sm:$0xff]  }
  0xbe   :  { %628 = vmatmul.mubr.bf16.vlgmr.msra.gmra.mrb[0].mxu0 %v197_v55  ;;  %v1437_v55 = vld [vmem:[%s1866_s3 + $0x88] sm:$0xff]  }
  0xbf   :  { %637 = vmatprep.mubr.bf16.mxu0 %v1444_v3  ;;  %v1426_v3 = vld [vmem:[%s1866_s3 + $0x70] sm:$0xff]  }
  0xc0   :  { %1263 = vmatprep.subr.bf16.mxu1 %v1426_v3 }
  0xc1   :  { %1264 = vmatpush3.bf16.msra.mxu1 %v1426_v3  ;;  %v1443_v3 = vld [vmem:[%s1866_s3 + $0xb8] sm:$0xff]  }
  0xc2   :  { %1265 = vmatprep.subr.bf16.mxu1 %v1427_v61 }
  0xc5   :  { %1266 = vmatpush3.bf16.msra.mxu1 %v1427_v61  ;;  %v1220_v61 = vld [vmem:[%s1868_s4] ss:$0 sm:$0xff] }
  0xc6   :  { %638 = vmatmul.mubr.bf16.gmra.mrb[4].mxu0 %v198_v58  ;;  %1271 = vmatprep.subr.bf16.mxu1 %v1428_v62  ;;  %v1440_v58 = vld [vmem:[%s1866_s3 + $0xa0] sm:$0xff]  }
 0x191   :  { %v629_v5 = vpop.f32.mrb[0].mxu0 }
 0x192   :  { %v1778_v6 = vadd.f32 %v661_v2, %v629_v5  ;;  %v631_v7 = vpop.f32.mrb[1].mxu0 }
 0x193   :  { %v669_v8 = vadd.f32 %v665_v4, %v631_v7  ;;  %v633_v9 = vpop.f32.mrb[2].mxu0 }
 0x194   :  { %v1780_v10 = vadd.f32 %v661_v2, %v633_v9  ;;  %v635_v11 = vpop.f32.mrb[3].mxu0 }
 0x195   :  { %v671_v12 = vadd.f32 %v665_v4, %v635_v11  ;;  %v676_v13 = vmax.f32 %v669_v8, 0.0 }
 0x197   :  { %v677_v14 = vmax.f32 %v671_v12, 0.0 }
 0x199   :  { %v680_v15 = vpack.c.bf16 %v677_v14, %v676_v13  ;;  %v639_v17 = vpop.f32.mrb[4].mxu0 }
 0x19a   :  { %v1782_v19 = vadd.f32 %v661_v2, %v639_v17  ;;  %v641_v20 = vpop.f32.mrb[5].mxu0 }
 0x19b   :  { %v673_v51 = vadd.f32 %v665_v4, %v641_v20  ;;  %v643_v21 = vpop.f32.mrb[6].mxu0  ;;  %1267 = vmatprep.mubr.bf16.mxu1 %v680_v15  ;;  %v683_v22 = vshrl.u32 %v680_v15, 16  ;;  %v686_v26 = vshll.u32 %v680_v15, 16 }
 0x19c   :  { %v1784_v23 = vadd.f32 %v661_v2, %v643_v21  ;;  %v645_v24 = vpop.f32.mrb[7].mxu0 }
 0x19d   :  { %v675_v25 = vadd.f32 %v665_v4, %v645_v24  ;;  %v678_v27 = vmax.f32 %v673_v51, 0.0  ;;  %v685_v30 = vrot.slane %v683_v22, 7  ;;  %v700_v34 = vrot.slane %v686_v26, 1 }
 0x19f   :  { %v679_v28 = vmax.f32 %v675_v25, 0.0  ;;  %v688_v36 = vor.u32 %v686_v26, %v685_v30  ;;  %v701_v38 = vor.u32 %v700_v34, %v683_v22 }
 0x1a1   :  { %v681_v31 = vpack.c.bf16 %v679_v28, %v678_v27  ;;  %v699_v42 = vsel %vm1657_vm10, %v680_v15, %v688_v36 }
 0x1a3   :  { %v690_v35 = vshrl.u32 %v681_v31, 16  ;;  %1268 = vmatmul.mubr.bf16.vlgmr.msra.gmra.mrb[0].mxu1 %v681_v31  ;;  %v693_v37 = vshll.u32 %v681_v31, 16 }
 0x1a4   :  { %1272 = vmatpush3.bf16.msra.mxu1 %v1428_v62 }
 0x1a5   :  { %1273 = vmatprep.subr.bf16.mxu1 %v1429_v32  ;;  %v702_v39 = vrot.slane %v693_v37, 1  ;;  %v692_v41 = vrot.slane %v690_v35, 7 }
 0x1a7   :  { %v703_v43 = vsel %vm136_vm8, %v701_v38, %v702_v39  ;;  %v695_v44 = vor.u32 %v693_v37, %v692_v41  ;;  %v704_v45 = vor.u32 %v702_v39, %v690_v35 }
 0x1a8   :  { %1274 = vmatpush3.bf16.msra.mxu1 %v1429_v32  ;;  %v708_v46 = vsel %vm1664_vm11, %v703_v43, %v699_v42  ;;  %v710_v47 = vsel %vm1742_vm3, %v699_v42, %v703_v43 }
 0x1a9   :  { %1287 = vmatprep.mubr.bf16.mxu1 %v708_v46  ;;  %1275 = vmatprep.subr.bf16.mxu1 %v1430_v40  ;;  %v696_v16 = vsel %vm115_vm5, %v685_v30, %v695_v44  ;;  %v707_v49 = vsel %vm1687_vm13, %v704_v45, %v681_v31 }
 0x1aa   :  { %v709_v50 = vsel %vm1698_vm14, %v707_v49, %v696_v16  ;;  %v711_v18 = vsel %vm1752_vm4, %v696_v16, %v707_v49 }
 0x1ac   :  { %1276 = vmatpush3.bf16.msra.mxu1 %v1430_v40 }
 0x1ad   :  { %1277 = vmatprep.subr.bf16.mxu1 %v1431_v48 }
 0x1b0   :  { %1278 = vmatpush3.bf16.msra.mxu1 %v1431_v48 }
 0x1b1   :  { %1279 = vmatprep.subr.bf16.mxu1 %v1432_v52 }
 0x1b4   :  { %1280 = vmatpush3.bf16.msra.mxu1 %v1432_v52 }
 0x1b5   :  { %1281 = vmatprep.subr.bf16.mxu1 %v1433_v53 }
 0x1b8   :  { %1282 = vmatpush3.bf16.msra.mxu1 %v1433_v53 }
 0x1b9   :  { %1283 = vmatprep.subr.bf16.mxu1 %v1434_v29 }
 0x1bc   :  { %1284 = vmatpush3.bf16.msra.mxu1 %v1434_v29 }
 0x1bd   :  { %1285 = vmatprep.subr.bf16.mxu1 %v1435_v33 }
 0x1c0   :  { %1286 = vmatpush3.bf16.msra.mxu1 %v1435_v33 }
 0x1c1   :  { %1291 = vmatprep.subr.bf16.mxu1 %v1436_v54 }
 0x1c3   :  { %1288 = vmatmul.mubr.bf16.vlgmr.msra.gmra.mrb[0].mxu1 %v709_v50 }
 0x1c4   :  { %1292 = vmatpush3.bf16.msra.mxu1 %v1436_v54  ;;  %1307 = vmatprep.mubr.bf16.mxu1 %v710_v47 }
 0x1c5   :  { %1293 = vmatprep.subr.bf16.mxu1 %v1437_v55 }
 0x1c8   :  { %1294 = vmatpush3.bf16.msra.mxu1 %v1437_v55 }
 0x1c9   :  { %1295 = vmatprep.subr.bf16.mxu1 %v1438_v56 }
 0x1cc   :  { %1296 = vmatpush3.bf16.msra.mxu1 %v1438_v56 }
 0x1cd   :  { %1297 = vmatprep.subr.bf16.mxu1 %v1439_v57 }
 0x1d0   :  { %1298 = vmatpush3.bf16.msra.mxu1 %v1439_v57 }
 0x1d1   :  { %1299 = vmatprep.subr.bf16.mxu1 %v1440_v58 }
 0x1d4   :  { %1300 = vmatpush3.bf16.msra.mxu1 %v1440_v58 }
 0x1d5   :  { %1301 = vmatprep.subr.bf16.mxu1 %v1441_v59 }
 0x1d8   :  { %1302 = vmatpush3.bf16.msra.mxu1 %v1441_v59 }
 0x1d9   :  { %1303 = vmatprep.subr.bf16.mxu1 %v1442_v60 }
 0x1dc   :  { %1304 = vmatpush3.bf16.msra.mxu1 %v1442_v60 }
 0x1dd   :  { %1305 = vmatprep.subr.bf16.mxu1 %v1443_v3 }
 0x1e0   :  { %1306 = vmatpush3.bf16.msra.mxu1 %v1443_v3 }
 0x1e3   :  { %1308 = vmatmul.mubr.bf16.vlgmr.msra.gmra.mrb[0].mxu1 %v711_v18 }
 0x2b6   :  { %v1309_v62 = vpop.f32.mrb[0].mxu1 }
 0x2b7   :  { %v1066_v63 = vadd.f32 %v1309_v62, %v1220_v61  ;;  %v1038_v0 = vpop.f32.mrb[1].mxu1 }
 0x2b8   :  { %v1064_v1 = vadd.f32 %v1220_v61, %v1038_v0  ;;  %v1310_v2 = vpop.f32.mrb[2].mxu1 }
 0x2b9   :  { %v1070_v4 = vadd.f32 %v1066_v63, %v1782_v19  ;;  %v1067_v5 = vadd.f32 %v1310_v2, %v1220_v61  ;;  %v1041_v7 = vpop.f32.mrb[3].mxu1 }
 0x2ba   :  { %v1068_v8 = vadd.f32 %v1064_v1, %v1778_v6  ;;  %v1065_v9 = vadd.f32 %v1220_v61, %v1041_v7 }
 0x2bb   :  { %1074 = vst [vmem:[%s1869_s5 + $0x10] sm:$0xff] %v1070_v4  ;;  %v1071_v11 = vadd.f32 %v1067_v5, %v1784_v23 }
 0x2bc   :  { %1072 = vst [vmem:[%s1869_s5] sm:$0xff] %v1068_v8  ;;  %v1069_v12 = vadd.f32 %v1065_v9, %v1780_v10 }
 0x2bd   :  { %1075 = vst [vmem:[%s1869_s5 + $0x18] sm:$0xff] %v1071_v11 }
 0x2be   :  { %1073 = vst [vmem:[%s1869_s5 + $0x8] sm:$0xff] %v1069_v12 }

</bundles_post_ra>
